<compile_context>
chip_gen: v6e
topology: v6e:2x2x1
jax: 0.10.0
libtpu: 0.0.40
codegen_flags: <defaults>
</compile_context>

<pallas_src>
import functools

import jax
import jax.numpy as jnp
from jax.experimental import pallas as pl
from jax.experimental.pallas import tpu as pltpu

_LANE = 128                       # lanes per vreg
_SUBLANE = 8                      # f32 sublanes per vreg
_FLOOR_LANES = 8192               # never tile the batch finer than this
_SPLIT_LANES = 4 * _FLOOR_LANES   # batches >= this always get >= 2 grid steps


def _cdiv(a, b):
    return -(-a // b)


def _round_up(a, m):
    return _cdiv(a, m) * m


# --------------------------------------------------------------------------- #
# Kernel
# --------------------------------------------------------------------------- #
def _clser_kernel(w_ref, b_ref, x_ref, o_ref):
    # w_ref : SMEM (2*in_dim,) f32   (row-major flattened nn.Linear weight)
    # b_ref : SMEM (2,)        f32
    # x_ref : VMEM (in_dim, R, 128) f32  -- batch spread over (sublane, lane)
    # o_ref : VMEM (2,      R, 128) f32
    in_dim = x_ref.shape[0]
    xs = [x_ref[k] for k in range(in_dim)]          # dense (R,128) planes

    def logits(j):
        # Unrolled VPU FMAs: sum_k w[j,k] * x[k] + b[j]
        acc = xs[0] * w_ref[j * in_dim + 0]
        for k in range(1, in_dim):
            acc = acc + xs[k] * w_ref[j * in_dim + k]
        return acc + b_ref[j]

    h0 = jnp.maximum(logits(0), 0.0)                # ReLU
    h1 = jnp.maximum(logits(1), 0.0)

    # 2-class softmax == logistic(h0 - h1): one EUP exp + one exact reciprocal
    # (exact keeps the 1e-5 tolerance).  No cross-lane reductions.  Garbage in
    # OOB remainder rows may produce NaN there, but Pallas drops that writeback.
    e = jnp.exp(h1 - h0)
    p0 = pl.reciprocal(1.0 + e, approx=False)
    o_ref[0, :, :] = p0
    o_ref[1, :, :] = 1.0 - p0


# --------------------------------------------------------------------------- #
# Tiling / pallas_call plumbing
# --------------------------------------------------------------------------- #
def _tile_rows(nb, tb_lanes):
    """Rows (of 128 lanes each) per grid step, and the number of steps."""
    cap_rows = tb_lanes // _LANE
    if nb > cap_rows or nb * _LANE >= _SPLIT_LANES:
        # Even number of near-equal, 8-row-aligned steps so a "parallel" batch
        # grid splits evenly across v7x's two TensorCores.
        n_pairs = max(1, _cdiv(nb, 2 * cap_rows))
        tbr = min(_round_up(_cdiv(nb, 2 * n_pairs), _SUBLANE), nb)
    else:
        tbr = nb                                     # single full-array block
    return tbr, _cdiv(nb, tbr)


def _call_kernel(x_planes, w_flat, b_vec, tbr, steps):
    in_dim, nb, _ = x_planes.shape
    # Double-buffered per-step VMEM footprint (input + output planes).
    vmem_bytes = 2 * (in_dim + 2) * tbr * _LANE * 4
    vmem_limit = None
    if vmem_bytes > 12 * 1024 * 1024:   # headroom vs. v5e's 16 MiB default
        vmem_limit = min(_round_up(vmem_bytes, 1 << 20) + (8 << 20), 64 << 20)
    return pl.pallas_call(
        _clser_kernel,
        out_shape=jax.ShapeDtypeStruct((2, nb, _LANE), jnp.float32),
        grid=(steps,),
        in_specs=[
            pl.BlockSpec(memory_space=pltpu.MemorySpace.SMEM),   # weight scalars
            pl.BlockSpec(memory_space=pltpu.MemorySpace.SMEM),   # bias scalars
            pl.BlockSpec((in_dim, tbr, _LANE), lambda i: (0, i, 0)),
        ],
        out_specs=pl.BlockSpec((2, tbr, _LANE), lambda i: (0, i, 0)),
        compiler_params=pltpu.CompilerParams(
            dimension_semantics=("parallel",),
            vmem_limit_bytes=vmem_limit),
    )(w_flat, b_vec, x_planes)


# --------------------------------------------------------------------------- #
# Public wrappers
# --------------------------------------------------------------------------- #
@functools.partial(jax.jit, static_argnames=("tb",))
def lidc_a2l_clser_forward(x, weight, bias, *, tb=65536):
    """
    Module contract: x (B, in_dim) f32, weight (2, in_dim), bias (2,) -> (B, 2).
    tb: max batch-tile size in samples/lanes (floored at 8192, rounded to 128).
    """
    x = x.astype(jnp.float32)
    B, in_dim = x.shape
    tb_lanes = max(_FLOOR_LANES, _round_up(int(tb), _LANE))

    Bp = _round_up(B, _LANE)
    nb = Bp // _LANE
    tbr, steps = _tile_rows(nb, tb_lanes)

    # Layout plumbing forced by the (B,6)/(B,2) contract: one thin input
    # pad+transpose (fused by XLA) and one thin output transpose.
    xp = x if Bp == B else jnp.pad(x, ((0, Bp - B), (0, 0)))
    x_planes = jnp.transpose(xp).reshape(in_dim, nb, _LANE)
    w_flat = weight.astype(jnp.float32).reshape(-1)
    b_vec = bias.astype(jnp.float32).reshape(-1)

    out_planes = _call_kernel(x_planes, w_flat, b_vec, tbr, steps)
    return jnp.transpose(out_planes.reshape(2, Bp)[:, :B])


@functools.partial(jax.jit, static_argnames=("tb",))
def lidc_a2l_clser_forward_batch_minor(xt, weight, bias, *, tb=65536):
    """
    Batch-minor entry point (no wrapper transposes): xt (in_dim, B) -> (2, B).
    When B is a multiple of 128 the only HBM traffic is the kernel's own.
    """
    xt = xt.astype(jnp.float32)
    in_dim, B = xt.shape
    tb_lanes = max(_FLOOR_LANES, _round_up(int(tb), _LANE))

    Bp = _round_up(B, _LANE)
    nb = Bp // _LANE
    tbr, steps = _tile_rows(nb, tb_lanes)

    xtp = xt if Bp == B else jnp.pad(xt, ((0, 0), (0, Bp - B)))
    x_planes = xtp.reshape(in_dim, nb, _LANE)
    w_flat = weight.astype(jnp.float32).reshape(-1)
    b_vec = bias.astype(jnp.float32).reshape(-1)

    out_planes = _call_kernel(x_planes, w_flat, b_vec, tbr, steps)
    return out_planes.reshape(2, Bp)[:, :B]


# --------------------------------------------------------------------------- #
# Reference / demo
# --------------------------------------------------------------------------- #
def _xavier_uniform(key, out_features, in_features):
    # Matches torch.nn.init.xavier_uniform_ with gain=1.
    limit = (6.0 / (in_features + out_features)) ** 0.5
    return jax.random.uniform(key, (out_features, in_features),
                              dtype=jnp.float32, minval=-limit, maxval=limit)


def _reference(x, weight, bias):
    logits = x @ weight.T + bias
    return jax.nn.softmax(jnp.maximum(logits, 0.0), axis=1)


if __name__ == "__main__":
    in_dim = 6          # att categories
    key = jax.random.PRNGKey(0)
    k_w, k1, k2, k3 = jax.random.split(key, 4)

    weight = _xavier_uniform(k_w, 2, in_dim)          # xavier_uniform_ init
    bias = jnp.zeros((2,), dtype=jnp.float32)         # zeros_ init

    # 1) Module-scale batch (single block).
    x = jax.random.normal(k1, (8, in_dim), dtype=jnp.float32)
    out = jax.block_until_ready(lidc_a2l_clser_forward(x, weight, bias))
    assert out.shape == (8, 2)
    assert jnp.allclose(out, _reference(x, weight, bias), atol=1e-5, rtol=1e-5)

    # 2) Gridded batch that is NOT a multiple of the tile or of 128: exercises
    #    the zero-padded lanes, the partially-OOB remainder block, and the
    #    two-step "parallel" grid (v7x even split).
    xb = jax.random.normal(k2, (8500, in_dim), dtype=jnp.float32)
    outb = jax.block_until_ready(
        lidc_a2l_clser_forward(xb, weight, bias, tb=8192))
    assert outb.shape == (8500, 2)
    assert jnp.allclose(outb, _reference(xb, weight, bias), atol=1e-5, rtol=1e-5)

    # 3) Batch-minor entry point (no wrapper transposes).
    xt = jax.random.normal(k3, (in_dim, 256), dtype=jnp.float32)
    outt = jax.block_until_ready(
        lidc_a2l_clser_forward_batch_minor(xt, weight, bias))
    assert outt.shape == (2, 256)
    assert jnp.allclose(outt.T, _reference(xt.T, weight, bias),
                        atol=1e-5, rtol=1e-5)

    print("KERNEL_OK")
</pallas_src>

<mosaic_0001>
module attributes {stable_mosaic.version = 11 : i64} {
  func.func @_clser_kernel(%arg0: i32, %arg1: memref<12xf32, #tpu.memory_space<smem>>, %arg2: memref<2xf32, #tpu.memory_space<smem>>, %arg3: memref<6x1x128xf32, #tpu.memory_space<vmem>>, %arg4: memref<2x1x128xf32, #tpu.memory_space<vmem>>) attributes {dimension_semantics = [#tpu.dimension_semantics<parallel>], iteration_bounds = array<i64: 1>, scalar_prefetch = 0 : i64, scratch_operands = 0 : i64, tpu.core_type = #tpu.core_type<tc>, window_params = [{transform_indices = @transform_0, window_bounds = array<i64: 12>}, {transform_indices = @transform_1, window_bounds = array<i64: 2>}, {transform_indices = @transform_2, window_bounds = array<i64: 6, 1, 128>}, {transform_indices = @transform_3, window_bounds = array<i64: 2, 1, 128>}]} {
    %c0 = arith.constant 0 : index
    %c0_0 = arith.constant 0 : index
    %c0_1 = arith.constant 0 : index
    %0 = vector.load %arg3[%c0, %c0_0, %c0_1] : memref<6x1x128xf32, #tpu.memory_space<vmem>>, vector<1x1x128xf32>
    %1 = vector.shape_cast %0 : vector<1x1x128xf32> to vector<1x128xf32>
    %c1 = arith.constant 1 : index
    %c0_2 = arith.constant 0 : index
    %c0_3 = arith.constant 0 : index
    %2 = vector.load %arg3[%c1, %c0_2, %c0_3] : memref<6x1x128xf32, #tpu.memory_space<vmem>>, vector<1x1x128xf32>
    %3 = vector.shape_cast %2 : vector<1x1x128xf32> to vector<1x128xf32>
    %c2 = arith.constant 2 : index
    %c0_4 = arith.constant 0 : index
    %c0_5 = arith.constant 0 : index
    %4 = vector.load %arg3[%c2, %c0_4, %c0_5] : memref<6x1x128xf32, #tpu.memory_space<vmem>>, vector<1x1x128xf32>
    %5 = vector.shape_cast %4 : vector<1x1x128xf32> to vector<1x128xf32>
    %c3 = arith.constant 3 : index
    %c0_6 = arith.constant 0 : index
    %c0_7 = arith.constant 0 : index
    %6 = vector.load %arg3[%c3, %c0_6, %c0_7] : memref<6x1x128xf32, #tpu.memory_space<vmem>>, vector<1x1x128xf32>
    %7 = vector.shape_cast %6 : vector<1x1x128xf32> to vector<1x128xf32>
    %c4 = arith.constant 4 : index
    %c0_8 = arith.constant 0 : index
    %c0_9 = arith.constant 0 : index
    %8 = vector.load %arg3[%c4, %c0_8, %c0_9] : memref<6x1x128xf32, #tpu.memory_space<vmem>>, vector<1x1x128xf32>
    %9 = vector.shape_cast %8 : vector<1x1x128xf32> to vector<1x128xf32>
    %c5 = arith.constant 5 : index
    %c0_10 = arith.constant 0 : index
    %c0_11 = arith.constant 0 : index
    %10 = vector.load %arg3[%c5, %c0_10, %c0_11] : memref<6x1x128xf32, #tpu.memory_space<vmem>>, vector<1x1x128xf32>
    %11 = vector.shape_cast %10 : vector<1x1x128xf32> to vector<1x128xf32>
    %c0_12 = arith.constant 0 : index
    %12 = memref.load %arg1[%c0_12] : memref<12xf32, #tpu.memory_space<smem>>
    %13 = vector.broadcast %12 : f32 to vector<1x128xf32>
    %14 = arith.mulf %1, %13 : vector<1x128xf32>
    %c1_13 = arith.constant 1 : index
    %15 = memref.load %arg1[%c1_13] : memref<12xf32, #tpu.memory_space<smem>>
    %16 = vector.broadcast %15 : f32 to vector<1x128xf32>
    %17 = arith.mulf %3, %16 : vector<1x128xf32>
    %18 = arith.addf %14, %17 : vector<1x128xf32>
    %c2_14 = arith.constant 2 : index
    %19 = memref.load %arg1[%c2_14] : memref<12xf32, #tpu.memory_space<smem>>
    %20 = vector.broadcast %19 : f32 to vector<1x128xf32>
    %21 = arith.mulf %5, %20 : vector<1x128xf32>
    %22 = arith.addf %18, %21 : vector<1x128xf32>
    %c3_15 = arith.constant 3 : index
    %23 = memref.load %arg1[%c3_15] : memref<12xf32, #tpu.memory_space<smem>>
    %24 = vector.broadcast %23 : f32 to vector<1x128xf32>
    %25 = arith.mulf %7, %24 : vector<1x128xf32>
    %26 = arith.addf %22, %25 : vector<1x128xf32>
    %c4_16 = arith.constant 4 : index
    %27 = memref.load %arg1[%c4_16] : memref<12xf32, #tpu.memory_space<smem>>
    %28 = vector.broadcast %27 : f32 to vector<1x128xf32>
    %29 = arith.mulf %9, %28 : vector<1x128xf32>
    %30 = arith.addf %26, %29 : vector<1x128xf32>
    %c5_17 = arith.constant 5 : index
    %31 = memref.load %arg1[%c5_17] : memref<12xf32, #tpu.memory_space<smem>>
    %32 = vector.broadcast %31 : f32 to vector<1x128xf32>
    %33 = arith.mulf %11, %32 : vector<1x128xf32>
    %34 = arith.addf %30, %33 : vector<1x128xf32>
    %c0_18 = arith.constant 0 : index
    %35 = memref.load %arg2[%c0_18] : memref<2xf32, #tpu.memory_space<smem>>
    %36 = vector.broadcast %35 : f32 to vector<1x128xf32>
    %37 = arith.addf %34, %36 : vector<1x128xf32>
    %cst = arith.constant 0.000000e+00 : f32
    %38 = vector.broadcast %cst : f32 to vector<1x128xf32>
    %39 = arith.maximumf %37, %38 : vector<1x128xf32>
    %c6 = arith.constant 6 : index
    %40 = memref.load %arg1[%c6] : memref<12xf32, #tpu.memory_space<smem>>
    %41 = vector.broadcast %40 : f32 to vector<1x128xf32>
    %42 = arith.mulf %1, %41 : vector<1x128xf32>
    %c7 = arith.constant 7 : index
    %43 = memref.load %arg1[%c7] : memref<12xf32, #tpu.memory_space<smem>>
    %44 = vector.broadcast %43 : f32 to vector<1x128xf32>
    %45 = arith.mulf %3, %44 : vector<1x128xf32>
    %46 = arith.addf %42, %45 : vector<1x128xf32>
    %c8 = arith.constant 8 : index
    %47 = memref.load %arg1[%c8] : memref<12xf32, #tpu.memory_space<smem>>
    %48 = vector.broadcast %47 : f32 to vector<1x128xf32>
    %49 = arith.mulf %5, %48 : vector<1x128xf32>
    %50 = arith.addf %46, %49 : vector<1x128xf32>
    %c9 = arith.constant 9 : index
    %51 = memref.load %arg1[%c9] : memref<12xf32, #tpu.memory_space<smem>>
    %52 = vector.broadcast %51 : f32 to vector<1x128xf32>
    %53 = arith.mulf %7, %52 : vector<1x128xf32>
    %54 = arith.addf %50, %53 : vector<1x128xf32>
    %c10 = arith.constant 10 : index
    %55 = memref.load %arg1[%c10] : memref<12xf32, #tpu.memory_space<smem>>
    %56 = vector.broadcast %55 : f32 to vector<1x128xf32>
    %57 = arith.mulf %9, %56 : vector<1x128xf32>
    %58 = arith.addf %54, %57 : vector<1x128xf32>
    %c11 = arith.constant 11 : index
    %59 = memref.load %arg1[%c11] : memref<12xf32, #tpu.memory_space<smem>>
    %60 = vector.broadcast %59 : f32 to vector<1x128xf32>
    %61 = arith.mulf %11, %60 : vector<1x128xf32>
    %62 = arith.addf %58, %61 : vector<1x128xf32>
    %c1_19 = arith.constant 1 : index
    %63 = memref.load %arg2[%c1_19] : memref<2xf32, #tpu.memory_space<smem>>
    %64 = vector.broadcast %63 : f32 to vector<1x128xf32>
    %65 = arith.addf %62, %64 : vector<1x128xf32>
    %cst_20 = arith.constant 0.000000e+00 : f32
    %66 = vector.broadcast %cst_20 : f32 to vector<1x128xf32>
    %67 = arith.maximumf %65, %66 : vector<1x128xf32>
    %68 = arith.subf %67, %39 : vector<1x128xf32>
    %69 = math.exp %68 : vector<1x128xf32>
    %cst_21 = arith.constant 1.000000e+00 : f32
    %70 = vector.broadcast %cst_21 : f32 to vector<1x128xf32>
    %71 = arith.addf %70, %69 : vector<1x128xf32>
    %72 = tpu.reciprocal %71 : vector<1x128xf32> -> vector<1x128xf32>
    %c0_22 = arith.constant 0 : index
    %c0_23 = arith.constant 0 : index
    %c0_24 = arith.constant 0 : index
    %73 = vector.load %arg4[%c0_22, %c0_23, %c0_24] : memref<2x1x128xf32, #tpu.memory_space<vmem>>, vector<1x1x128xf32>
    %74 = vector.shape_cast %73 : vector<1x1x128xf32> to vector<1x128xf32>
    %75 = vector.shape_cast %72 : vector<1x128xf32> to vector<1x1x128xf32>
    tpu.vector_store %arg4[%c0_22, %c0_23, %c0_24], %75 {strides = array<i32>} : memref<2x1x128xf32, #tpu.memory_space<vmem>>, vector<1x1x128xf32>,
    %cst_25 = arith.constant 1.000000e+00 : f32
    %76 = vector.broadcast %cst_25 : f32 to vector<1x128xf32>
    %77 = arith.subf %76, %72 : vector<1x128xf32>
    %c1_26 = arith.constant 1 : index
    %c0_27 = arith.constant 0 : index
    %c0_28 = arith.constant 0 : index
    %78 = vector.load %arg4[%c1_26, %c0_27, %c0_28] : memref<2x1x128xf32, #tpu.memory_space<vmem>>, vector<1x1x128xf32>
    %79 = vector.shape_cast %78 : vector<1x1x128xf32> to vector<1x128xf32>
    %80 = vector.shape_cast %77 : vector<1x128xf32> to vector<1x1x128xf32>
    tpu.vector_store %arg4[%c1_26, %c0_27, %c0_28], %80 {strides = array<i32>} : memref<2x1x128xf32, #tpu.memory_space<vmem>>, vector<1x1x128xf32>,
    return
  }
  func.func @transform_0(%arg0: i32) -> i32 {
    %c0_i32 = arith.constant 0 : i32
    %c0_i32_0 = arith.constant 0 : i32
    return %c0_i32 : i32
  }
  func.func @transform_1(%arg0: i32) -> i32 {
    %c0_i32 = arith.constant 0 : i32
    %c0_i32_0 = arith.constant 0 : i32
    return %c0_i32 : i32
  }
  func.func @transform_2(%arg0: i32) -> (i32, i32, i32) {
    %c0_i32 = arith.constant 0 : i32
    %c0_i32_0 = arith.constant 0 : i32
    %c0_i32_1 = arith.constant 0 : i32
    return %c0_i32, %arg0, %c0_i32_0 : i32, i32, i32
  }
  func.func @transform_3(%arg0: i32) -> (i32, i32, i32) {
    %c0_i32 = arith.constant 0 : i32
    %c0_i32_0 = arith.constant 0 : i32
    %c0_i32_1 = arith.constant 0 : i32
    return %c0_i32, %arg0, %c0_i32_0 : i32, i32, i32
  }
}

</mosaic_0001>

<bundles_post_ra>
// kernel: lidc_a2l_clser_forward.1
= control target key start
LH: loop header
LB: loop body
LE: loop exit
PB: predicated region body
PF: predicated region fallthrough
CT: control target
= control target key end

     0   :  { %8 = vsyncpa [#allocation3], 0  ;;  %s226_s0 = inlined_call_operand.vmem [shape: f32[12], index: 0, kind: input, shape index: {}]   ;;  %s227_s1 = inlined_call_operand.vmem [shape: f32[2], index: 1, kind: input, shape index: {}]   ;;  %s228_s2 = inlined_call_operand.vmem [shape: f32[6,1,128], index: 2, kind: input, shape index: {}]   ;;  %s229_s3 = inlined_call_operand.vmem [shape: f32[2,1,128], index: 3, kind: output, shape index: {}]  }
   0x1   :  { %s16_s14 = sshll.u32 %s226_s0, 4  ;;  %s17_s14 = int_to_ptr.vmem [resolvable:$true] %s16_s14 }
   0x2   :  { %9 = vsyncpa [#allocation5], 0  ;;  %s26_s17 = sshll.u32 %s227_s1, 4  ;;  %s143_s18 = scalar_lea.vmem %s17_s14, 16  ;;  %s27_s17 = int_to_ptr.vmem [resolvable:$true] %s26_s17 }
   0x3   :  { %p144_p0 = scmp.ne.s32.totalorder %s17_s14, %s143_s18  ;;  %p148_p1 = scmp.lt.s32.totalorder %s17_s14, %s17_s14 }
   0x4   :  { %p149_p2 = scmp.lt.s32.totalorder %s143_s18, %s143_s18 }
   0x6   :  { %p150_p3 = por %p149_p2, %p148_p1 }
   0x8   :  { %p151_p4 = pnand %p150_p3, %p144_p0 }
   0xa   :  { %154 = shalt.err (!%p151_p4)
}
   0xb   :  { %s171_s19 = smov [#allocation2]   ;;  %s155_s20 = scalar_lea.vmem %s27_s17, 16 }
   0xc   :  { %19 = dma.vmem_to_smem %s17_s14, 16, %s171_s19, [#allocation3]  }
   0xd   :  { %p156_p5 = scmp.ne.s32.totalorder %s27_s17, %s155_s20  ;;  %p160_p6 = scmp.lt.s32.totalorder %s27_s17, %s27_s17 }
   0xe   :  { %p161_p7 = scmp.lt.s32.totalorder %s155_s20, %s155_s20 }
  0x10   :  { %p162_p8 = por %p161_p7, %p160_p6 }
  0x12   :  { %p163_p9 = pnand %p162_p8, %p156_p5 }
  0x14   :  { %166 = shalt.err (!%p163_p9)
}
  0x15   :  { %s172_s0 = smov [#allocation4]  }
  0x16   :  { %29 = dma.vmem_to_smem %s27_s17, 16, %s172_s0, [#allocation5]  }
  0x17   :  { %167 = dma.done.wait [#allocation3], 16  }
  0x18   :  { %168 = vsyncadd [#allocation3], 4294967280 }
  0x19   :  { %169 = dma.done.wait [#allocation5], 16  }
  0x1a   :  { %170 = vsyncadd [#allocation5], 4294967280 }
  0x1b   :  { %38 = sfence }
  0x1c   :  { %s50_s1 = sld [smem:[#allocation2]]  ;;  %v39_v0 = vld [vmem:[%s228_s2] sm:$0x1]  ;;  %v119_v1 = vld [vmem:[%s228_s2 + $0x1] sm:$0x1] }
  0x1d   :  { %s124_s21 = sld [smem:[#allocation2 + $0x1]]  ;;  %v120_v2 = vld [vmem:[%s228_s2 + $0x2] sm:$0x1]  ;;  %v121_v4 = vld [vmem:[%s228_s2 + $0x3] sm:$0x1] }
  0x1e   :  { %s125_s22 = sld [smem:[#allocation2 + $0x2]]  ;;  %v122_v9 = vld [vmem:[%s228_s2 + $0x4] sm:$0x1]  ;;  %v123_v15 = vld [vmem:[%s228_s2 + $0x5] sm:$0x1] }
  0x1f   :  { %s126_s23 = sld [smem:[#allocation2 + $0x3]] }
  0x20   :  { %s127_s26 = sld [smem:[#allocation2 + $0x4]] }
  0x21   :  { %s128_s29 = sld [smem:[#allocation2 + $0x5]] }
  0x22   :  { %v51_v3 = vstv %s50_s1  ;;  %s208_s5 = sld [smem:[#allocation4]] }
  0x23   :  { %v52_v5 = vmul.f32 %v51_v3, %v39_v0  ;;  %v54_v6 = vstv %s124_s21  ;;  %s129_s8 = sld [smem:[#allocation2 + $0x6]] }
  0x24   :  { %v55_v7 = vmul.f32 %v119_v1, %v54_v6  ;;  %v58_v8 = vstv %s125_s22  ;;  %s130_s9 = sld [smem:[#allocation2 + $0x7]] }
  0x25   :  { %v59_v10 = vmul.f32 %v120_v2, %v58_v8  ;;  %v62_v11 = vstv %s126_s23  ;;  %s131_s12 = sld [smem:[#allocation2 + $0x8]] }
  0x26   :  { %v56_v12 = vadd.f32 %v55_v7, %v52_v5  ;;  %v63_v13 = vmul.f32 %v121_v4, %v62_v11  ;;  %v66_v14 = vstv %s127_s26  ;;  %s132_s13 = sld [smem:[#allocation2 + $0x9]] }
  0x27   :  { %s133_s14 = sld [smem:[#allocation2 + $0xa]]  ;;  %v67_v17 = vmul.f32 %v122_v9, %v66_v14  ;;  %v70_v18 = vstv %s128_s29 }
  0x28   :  { %v60_v16 = vadd.f32 %v59_v10, %v56_v12  ;;  %s134_s17 = sld [smem:[#allocation2 + $0xb]]  ;;  %v71_v23 = vmul.f32 %v123_v15, %v70_v18  ;;  %v74_v36 = vstv %s208_s5 }
  0x29   :  { %v78_v19 = vstv %s129_s8  ;;  %s135_s18 = sld [smem:[#allocation4 + $0x1]] }
  0x2a   :  { %v64_v20 = vadd.f32 %v63_v13, %v60_v16  ;;  %v79_v21 = vmul.f32 %v78_v19, %v39_v0  ;;  %v81_v22 = vstv %s130_s9 }
  0x2b   :  { %v82_v24 = vmul.f32 %v119_v1, %v81_v22  ;;  %v85_v25 = vstv %s131_s12 }
  0x2c   :  { %v68_v26 = vadd.f32 %v67_v17, %v64_v20  ;;  %v86_v27 = vmul.f32 %v120_v2, %v85_v25  ;;  %v89_v28 = vstv %s132_s13 }
  0x2d   :  { %v83_v29 = vadd.f32 %v82_v24, %v79_v21  ;;  %v90_v30 = vmul.f32 %v121_v4, %v89_v28  ;;  %v93_v31 = vstv %s133_s14 }
  0x2e   :  { %v97_v32 = vstv %s134_s17  ;;  %v72_v33 = vadd.f32 %v71_v23, %v68_v26  ;;  %v94_v35 = vmul.f32 %v122_v9, %v93_v31 }
  0x2f   :  { %v87_v34 = vadd.f32 %v86_v27, %v83_v29  ;;  %v98_v38 = vmul.f32 %v123_v15, %v97_v32  ;;  %v101_v41 = vstv %s135_s18 }
  0x30   :  { %v75_v39 = vadd.f32 %v74_v36, %v72_v33 }
  0x31   :  { %v91_v37 = vadd.f32 %v90_v30, %v87_v34 }
  0x32   :  { %v76_v43 = vmax.f32 %v75_v39, 0.0 }
  0x33   :  { %v95_v40 = vadd.f32 %v94_v35, %v91_v37 }
  0x35   :  { %v99_v42 = vadd.f32 %v98_v38, %v95_v40 }
  0x37   :  { %v102_v44 = vadd.f32 %v101_v41, %v99_v42 }
  0x39   :  { %v103_v45 = vmax.f32 %v102_v44, 0.0 }
  0x3b   :  { %v104_v46 = vsub.f32 %v103_v45, %v76_v43 }
  0x3d   :  { %v105_v47 = vmul.f32 1.442695, %v104_v46 }
  0x3f   :  { %139 = vpow2.f32 %v105_v47 }
  0x4c   :  { %v140_v48 = vpop.eup %139 }
  0x4d   :  { %v107_v49 = vadd.f32 1.0, %v140_v48 }
  0x4f   :  { %141 = vrcp.f32 %v107_v49 }
  0x5c   :  { %v142_v50 = vpop.eup %141 }
  0x5d   :  { %109 = vst [vmem:[%s229_s3] sm:$0x1] %v142_v50  ;;  %v110_v51 = vsub.f32 1.0, %v142_v50 }
  0x5f   :  { %136 = vst [vmem:[%s229_s3 + $0x1] sm:$0x1] %v110_v51 }
  0x60   :  { %117 = vsyncpa [#allocation3], 1 }
  0x61   :  { %118 = vsyncpa [#allocation5], 1 }

</bundles_post_ra>
